<compile_context>
chip_gen: v6e
topology: v6e:2x2x1
jax: 0.10.0
libtpu: 0.0.40
codegen_flags: <defaults>
</compile_context>

<pallas_src>
import functools
import math

import jax
import jax.numpy as jnp
import numpy as np
from jax.experimental import pallas as pl
from jax.experimental.pallas import tpu as pltpu

BN_EPS = 1e-5


def _round_up(x, m):
    return (x + m - 1) // m * m


def _cdiv(a, b):
    return -(-a // b)


def _vmem_budget_bytes():
    try:
        cap = int(pltpu.get_tpu_info().vmem_capacity_bytes)
    except Exception:
        cap = 64 * 2**20          # conservative: v7x has 64 MiB per TensorCore
    return min(cap // 3, 24 * 2**20)


def _choose_tile_rows(S, N, KP, EP, budget):
    """Row tile for the per-image grids (multiple of 128, or == padded S)."""
    if S <= 128:
        return _round_up(S, 8)    # tile == (padded) image -> always legal
    # Bytes that scale with TR in pass 1: double-buffered bf16 patches + bf16 y
    # plus the f32 accumulator.
    per_row = 2 * KP * 2 + 2 * EP * 2 + EP * 4
    fixed = 2 * KP * EP * 2 + (2 << 20)
    tr = (budget - fixed) // per_row
    tr = max(128, min(tr, 2048))
    tr = (tr // 128) * 128
    # Keep >= 4 total grid steps so both v7x TensorCores get balanced work.
    min_tiles = _cdiv(4, max(N, 1))
    tr = min(tr, _round_up(_cdiv(S, min_tiles), 128))
    return int(max(tr, 128))


# ---- pass 1: conv-as-matmul (no bias) and per-tile partial BN statistics ----
def _conv_stats_kernel(patches_ref, w_ref, y_ref, sum_ref, sq_ref):
    # MXU matmul: bf16 operands, f32 accumulation.  No bias and no row masking:
    # padded rows / padded K columns are exactly zero, so padded rows give
    # y == 0 and contribute nothing to the statistics.
    acc = jnp.dot(patches_ref[0], w_ref[...],
                  preferred_element_type=jnp.float32)          # (TR, EP) f32
    y_ref[...] = acc.astype(y_ref.dtype)[None]                 # bf16 store
    sum_ref[...] = jnp.sum(acc, axis=0, keepdims=True)[None]   # (1, 1, EP)
    sq_ref[...] = jnp.sum(acc * acc, axis=0, keepdims=True)[None]


# ---- pass 2: per-channel affine ---------------------------------------------
def _bn_apply_nchw_kernel(y_ref, scale_ref, shift_ref, o_ref, *, e):
    y = y_ref[0].astype(jnp.float32)                           # (TR, EP)
    out = y * scale_ref[...] + shift_ref[...]                  # (TR, EP)
    # Emit channel-major directly (removes the trailing NCHW transpose pass).
    o_ref[...] = out.T[:e, :].astype(o_ref.dtype)[None]        # (1, E, TR)


def _bn_apply_nhwc_kernel(y_ref, scale_ref, shift_ref, o_ref):
    y = y_ref[0].astype(jnp.float32)
    o_ref[...] = (y * scale_ref[...] + shift_ref[...]).astype(o_ref.dtype)[None]


def overlap_patch_embed(x, weight, bias, gamma, beta, *, stride=4,
                        channels_last=False):
    """x: (N, C, H, W) NCHW.  weight: (E, C, kh, kw) (PyTorch Conv2d layout).

    Conv2d(k, stride, pad=k//2) -> BatchNorm2d with batch statistics
    (training mode), matching the PyTorch module's forward.  Returns
    (out, Ho, Wo); out is NCHW unless channels_last=True ((N, Ho, Wo, E)).
    """
    N, C, H, W = x.shape
    E, _, kh, kw = weight.shape
    ph, pw = kh // 2, kw // 2
    Ho = (H + 2 * ph - kh) // stride + 1
    Wo = (W + 2 * pw - kw) // stride + 1
    S = Ho * Wo                        # spatial positions per image
    K = C * kh * kw

    KP = _round_up(K, 128)             # contraction dim (MXU fill)
    EP = _round_up(E, 128)             # lane-dense channel dim
    budget = _vmem_budget_bytes()
    TR = _choose_tile_rows(S, N, KP, EP, budget)
    SP = _round_up(S, TR)
    tiles = SP // TR
    out_itemsize = np.dtype(x.dtype).itemsize

    # ---- im2col glue (bf16 end-to-end; single pad to (N, SP, KP)) ----
    xb = x.astype(jnp.bfloat16)
    xp = jnp.pad(xb, ((0, 0), (0, 0), (ph, ph), (pw, pw)))
    cols = []
    for i in range(kh):
        for j in range(kw):
            cols.append(xp[:, :, i:i + stride * Ho:stride,
                           j:j + stride * Wo:stride])
    patches = jnp.stack(cols, axis=2)                  # (N, C, kh*kw, Ho, Wo)
    patches = patches.transpose(0, 3, 4, 1, 2).reshape(N, S, K)
    patches_p = jnp.pad(patches, ((0, 0), (0, SP - S), (0, KP - K)))

    w2d = jnp.pad(weight.reshape(E, K).T.astype(jnp.bfloat16),
                  ((0, KP - K), (0, EP - E)))

    # ---- pass 1: conv + per-tile partial BN stats (grid fully parallel) ----
    fp1 = (2 * TR * KP * 2 + 2 * TR * EP * 2 + 2 * KP * EP * 2
           + 4 * EP * 4 + 2 * TR * EP * 4)
    vmem1 = int(min(max(32 * 2**20, fp1 + 8 * 2**20), 56 * 2**20))
    y, s_part, ss_part = pl.pallas_call(
        _conv_stats_kernel,
        out_shape=(jax.ShapeDtypeStruct((N, SP, EP), jnp.bfloat16),
                   jax.ShapeDtypeStruct((N * tiles, 1, EP), jnp.float32),
                   jax.ShapeDtypeStruct((N * tiles, 1, EP), jnp.float32)),
        grid=(N, tiles),
        in_specs=[
            pl.BlockSpec((1, TR, KP), lambda n, i: (n, i, 0)),
            pl.BlockSpec((KP, EP), lambda n, i: (0, 0)),
        ],
        out_specs=(
            pl.BlockSpec((1, TR, EP), lambda n, i: (n, i, 0)),
            pl.BlockSpec((1, 1, EP), lambda n, i: (n * tiles + i, 0, 0)),
            pl.BlockSpec((1, 1, EP), lambda n, i: (n * tiles + i, 0, 0)),
        ),
        compiler_params=pltpu.CompilerParams(
            dimension_semantics=("parallel", "parallel"),
            vmem_limit_bytes=vmem1),
    )(patches_p, w2d)

    # ---- tiny glue: reduce partials -> per-channel scale/shift (all f32) ----
    count = float(N * S)
    s_sum = jnp.sum(s_part[:, 0, :], axis=0)            # (EP,)
    s_sq = jnp.sum(ss_part[:, 0, :], axis=0)            # (EP,)
    mean_nb = s_sum / count                              # mean of conv w/o bias
    var = jnp.maximum(s_sq / count - mean_nb * mean_nb, 0.0)   # bias-invariant
    inv = jax.lax.rsqrt(var + BN_EPS)

    def pad_vec(v):
        return jnp.pad(v.astype(jnp.float32), (0, EP - E))

    g, bt, bs = pad_vec(gamma), pad_vec(beta), pad_vec(bias)
    mean = mean_nb + bs                                  # full conv-output mean
    scale = (g * inv).reshape(1, EP)
    shift = (bt + (bs - mean) * g * inv).reshape(1, EP)  # bias folded into BN

    # ---- pass 2: per-channel affine (mem-bound, fully parallel) ----
    if channels_last:
        fp2 = 2 * TR * EP * 2 + 2 * TR * EP * out_itemsize + 2 * TR * EP * 4
        vmem2 = int(min(max(32 * 2**20, fp2 + 8 * 2**20), 56 * 2**20))
        out3 = pl.pallas_call(
            _bn_apply_nhwc_kernel,
            out_shape=jax.ShapeDtypeStruct((N, SP, EP), x.dtype),
            grid=(N, tiles),
            in_specs=[
                pl.BlockSpec((1, TR, EP), lambda n, i: (n, i, 0)),
                pl.BlockSpec((1, EP), lambda n, i: (0, 0)),
                pl.BlockSpec((1, EP), lambda n, i: (0, 0)),
            ],
            out_specs=pl.BlockSpec((1, TR, EP), lambda n, i: (n, i, 0)),
            compiler_params=pltpu.CompilerParams(
                dimension_semantics=("parallel", "parallel"),
                vmem_limit_bytes=vmem2),
        )(y, scale, shift)
        out = out3[:, :S, :E].reshape(N, Ho, Wo, E)
    else:
        fp2 = (2 * TR * EP * 2 + 2 * E * TR * out_itemsize
               + 2 * TR * EP * 4 + 4 * EP * 4)
        vmem2 = int(min(max(32 * 2**20, fp2 + 8 * 2**20), 56 * 2**20))
        out3 = pl.pallas_call(
            functools.partial(_bn_apply_nchw_kernel, e=E),
            out_shape=jax.ShapeDtypeStruct((N, E, SP), x.dtype),
            grid=(N, tiles),
            in_specs=[
                pl.BlockSpec((1, TR, EP), lambda n, i: (n, i, 0)),
                pl.BlockSpec((1, EP), lambda n, i: (0, 0)),
                pl.BlockSpec((1, EP), lambda n, i: (0, 0)),
            ],
            out_specs=pl.BlockSpec((1, E, TR), lambda n, i: (n, 0, i)),
            compiler_params=pltpu.CompilerParams(
                dimension_semantics=("parallel", "parallel"),
                vmem_limit_bytes=vmem2),
        )(y, scale, shift)
        out = out3 if SP == S else out3[:, :, :S]
        out = out.reshape(N, E, Ho, Wo)
    return out, Ho, Wo


def _reference(x, weight, bias, gamma, beta, stride=4):
    """Pure-JAX f32 reference (conv + training-mode batchnorm)."""
    kh, kw = weight.shape[2], weight.shape[3]
    y = jax.lax.conv_general_dilated(
        x, weight, window_strides=(stride, stride),
        padding=((kh // 2, kh // 2), (kw // 2, kw // 2)),
        dimension_numbers=("NCHW", "OIHW", "NCHW"))
    y = y + bias.reshape(1, -1, 1, 1)
    mean = jnp.mean(y, axis=(0, 2, 3), keepdims=True)
    var = jnp.mean((y - mean) ** 2, axis=(0, 2, 3), keepdims=True)
    y = (y - mean) * jax.lax.rsqrt(var + BN_EPS)
    return y * gamma.reshape(1, -1, 1, 1) + beta.reshape(1, -1, 1, 1)


if __name__ == "__main__":
    # Small shapes consistent with the module's forward.
    N, C, H, W = 2, 4, 16, 16
    E, patch_size, stride = 32, 7, 4

    key = jax.random.PRNGKey(0)
    kx, kw_ = jax.random.split(key)

    x = jax.random.normal(kx, (N, C, H, W), dtype=jnp.float32)

    # Deterministic init mirroring _init_weights for nn.Conv2d:
    # weight ~ N(0, sqrt(2 / fan_out)), fan_out = kh*kw*E ; bias = 0.
    fan_out = patch_size * patch_size * E
    weight = jax.random.normal(kw_, (E, C, patch_size, patch_size),
                               dtype=jnp.float32) * math.sqrt(2.0 / fan_out)
    bias = jnp.zeros((E,), dtype=jnp.float32)
    # BatchNorm2d default init: weight (gamma) = 1, bias (beta) = 0.
    gamma = jnp.ones((E,), dtype=jnp.float32)
    beta = jnp.zeros((E,), dtype=jnp.float32)

    out, Ho, Wo = overlap_patch_embed(x, weight, bias, gamma, beta, stride=stride)
    out = jax.block_until_ready(out)

    ref = _reference(x, weight, bias, gamma, beta, stride=stride)
    assert out.shape == (N, E, Ho, Wo), out.shape
    # Tolerance covers the bf16 MXU path plus the bf16 intermediate y
    # (BN statistics stay f32), vs the f32 reference.
    np.testing.assert_allclose(np.asarray(out), np.asarray(ref),
                               rtol=2e-2, atol=2e-2)
    print("KERNEL_OK")
</pallas_src>

<mosaic_0001>
module attributes {stable_mosaic.version = 11 : i64} {
  func.func @_conv_stats_kernel(%arg0: i32, %arg1: i32, %arg2: memref<1x16x256xbf16, #tpu.memory_space<vmem>>, %arg3: memref<256x128xbf16, #tpu.memory_space<vmem>>, %arg4: memref<1x16x128xbf16, #tpu.memory_space<vmem>>, %arg5: memref<1x1x128xf32, #tpu.memory_space<vmem>>, %arg6: memref<1x1x128xf32, #tpu.memory_space<vmem>>) attributes {dimension_semantics = [#tpu.dimension_semantics<parallel>, #tpu.dimension_semantics<parallel>], iteration_bounds = array<i64: 2, 1>, scalar_prefetch = 0 : i64, scratch_operands = 0 : i64, tpu.core_type = #tpu.core_type<tc>, window_params = [{transform_indices = @transform_0, window_bounds = array<i64: 1, 16, 256>}, {pipeline_mode = #tpu.pipeline_mode<synchronous>, transform_indices = @transform_1, window_bounds = array<i64: 256, 128>}, {transform_indices = @transform_2, window_bounds = array<i64: 1, 16, 128>}, {transform_indices = @transform_3, window_bounds = array<i64: 1, 1, 128>}, {transform_indices = @transform_4, window_bounds = array<i64: 1, 1, 128>}]} {
    %c0 = arith.constant 0 : index
    %c0_0 = arith.constant 0 : index
    %c0_1 = arith.constant 0 : index
    %0 = vector.load %arg2[%c0, %c0_0, %c0_1] : memref<1x16x256xbf16, #tpu.memory_space<vmem>>, vector<1x16x256xbf16>
    %1 = vector.shape_cast %0 : vector<1x16x256xbf16> to vector<16x256xbf16>
    %c0_2 = arith.constant 0 : index
    %c0_3 = arith.constant 0 : index
    %2 = vector.load %arg3[%c0_2, %c0_3] : memref<256x128xbf16, #tpu.memory_space<vmem>>, vector<256x128xbf16>
    %cst = arith.constant dense<0.000000e+00> : vector<16x128xf32>
    %3 = tpu.matmul %1, %2, %cst {dimension_numbers = #tpu.dot_dimension_numbers<[1], [0], [0], [1], [0, 0, 1, 1], [], []>} : vector<16x256xbf16>, vector<256x128xbf16>, vector<16x128xf32> -> vector<16x128xf32>
    %4 = arith.truncf %3 : vector<16x128xf32> to vector<16x128xbf16>
    %5 = vector.shape_cast %4 : vector<16x128xbf16> to vector<1x16x128xbf16>
    %c0_4 = arith.constant 0 : index
    %c0_5 = arith.constant 0 : index
    %c0_6 = arith.constant 0 : index
    %6 = vector.load %arg4[%c0_4, %c0_5, %c0_6] : memref<1x16x128xbf16, #tpu.memory_space<vmem>>, vector<1x16x128xbf16>
    tpu.vector_store %arg4[%c0_4, %c0_5, %c0_6], %5 {strides = array<i32>} : memref<1x16x128xbf16, #tpu.memory_space<vmem>>, vector<1x16x128xbf16>,
    %cst_7 = arith.constant dense<0.000000e+00> : vector<128xf32>
    %7 = vector.multi_reduction <add>, %3, %cst_7 [0] : vector<16x128xf32> to vector<128xf32>
    %8 = vector.shape_cast %7 : vector<128xf32> to vector<1x128xf32>
    %9 = vector.shape_cast %8 : vector<1x128xf32> to vector<1x1x128xf32>
    %c0_8 = arith.constant 0 : index
    %c0_9 = arith.constant 0 : index
    %c0_10 = arith.constant 0 : index
    %10 = vector.load %arg5[%c0_8, %c0_9, %c0_10] : memref<1x1x128xf32, #tpu.memory_space<vmem>>, vector<1x1x128xf32>
    tpu.vector_store %arg5[%c0_8, %c0_9, %c0_10], %9 {strides = array<i32>} : memref<1x1x128xf32, #tpu.memory_space<vmem>>, vector<1x1x128xf32>,
    %11 = arith.mulf %3, %3 : vector<16x128xf32>
    %cst_11 = arith.constant dense<0.000000e+00> : vector<128xf32>
    %12 = vector.multi_reduction <add>, %11, %cst_11 [0] : vector<16x128xf32> to vector<128xf32>
    %13 = vector.shape_cast %12 : vector<128xf32> to vector<1x128xf32>
    %14 = vector.shape_cast %13 : vector<1x128xf32> to vector<1x1x128xf32>
    %c0_12 = arith.constant 0 : index
    %c0_13 = arith.constant 0 : index
    %c0_14 = arith.constant 0 : index
    %15 = vector.load %arg6[%c0_12, %c0_13, %c0_14] : memref<1x1x128xf32, #tpu.memory_space<vmem>>, vector<1x1x128xf32>
    tpu.vector_store %arg6[%c0_12, %c0_13, %c0_14], %14 {strides = array<i32>} : memref<1x1x128xf32, #tpu.memory_space<vmem>>, vector<1x1x128xf32>,
    return
  }
  func.func @transform_0(%arg0: i32, %arg1: i32) -> (i32, i32, i32) {
    %c0_i32 = arith.constant 0 : i32
    %c0_i32_0 = arith.constant 0 : i32
    return %arg0, %arg1, %c0_i32 : i32, i32, i32
  }
  func.func @transform_1(%arg0: i32, %arg1: i32) -> (i32, i32) {
    %c0_i32 = arith.constant 0 : i32
    %c0_i32_0 = arith.constant 0 : i32
    %c0_i32_1 = arith.constant 0 : i32
    return %c0_i32, %c0_i32_0 : i32, i32
  }
  func.func @transform_2(%arg0: i32, %arg1: i32) -> (i32, i32, i32) {
    %c0_i32 = arith.constant 0 : i32
    %c0_i32_0 = arith.constant 0 : i32
    return %arg0, %arg1, %c0_i32 : i32, i32, i32
  }
  func.func @transform_3(%arg0: i32, %arg1: i32) -> (i32, i32, i32) {
    %c1_i32 = arith.constant 1 : i32
    %0 = arith.muli %arg0, %c1_i32 : i32
    %1 = arith.addi %0, %arg1 : i32
    %c0_i32 = arith.constant 0 : i32
    %c0_i32_0 = arith.constant 0 : i32
    %c0_i32_1 = arith.constant 0 : i32
    return %1, %c0_i32, %c0_i32_0 : i32, i32, i32
  }
  func.func @transform_4(%arg0: i32, %arg1: i32) -> (i32, i32, i32) {
    %c1_i32 = arith.constant 1 : i32
    %0 = arith.muli %arg0, %c1_i32 : i32
    %1 = arith.addi %0, %arg1 : i32
    %c0_i32 = arith.constant 0 : i32
    %c0_i32_0 = arith.constant 0 : i32
    %c0_i32_1 = arith.constant 0 : i32
    return %1, %c0_i32, %c0_i32_0 : i32, i32, i32
  }
}

</mosaic_0001>

<bundles_post_ra>
// kernel: tpu_custom_call.1
= control target key start
LH: loop header
LB: loop body
LE: loop exit
PB: predicated region body
PF: predicated region fallthrough
CT: control target
= control target key end

     0   :  { %s1350_s0 = inlined_call_operand.hbm [shape: bf16[2,16,256], index: 0, kind: input, shape index: {}]   ;;  %s1351_s1 = inlined_call_operand.hbm [shape: bf16[256,128], index: 1, kind: input, shape index: {}]   ;;  %s1352_s2 = inlined_call_operand.hbm [shape: bf16[2,16,128], index: 2, kind: output, shape index: {0}]   ;;  %s1353_s3 = inlined_call_operand.hbm [shape: f32[2,1,128], index: 3, kind: output, shape index: {1}]   ;;  %s1354_s4 = inlined_call_operand.hbm [shape: f32[2,1,128], index: 4, kind: output, shape index: {2}]  }
   0x1   :  { %1357 = sst [smem:[#allocation15_spill]] %s1351_s1 }
   0x2   :  { %10 = vsyncpa [#allocation3], 0 }
   0x3   :  { %12 = vsyncpa [#allocation3 + $0x1], 0 }
   0x4   :  { %13 = vsyncpa [#allocation6], 0 }
   0x5   :  { %14 = vsyncpa [#allocation4], 0 }
   0x6   :  { %16 = vsyncpa [#allocation4 + $0x1], 0 }
   0x7   :  { %17 = vsyncpa [#allocation9], 0 }
   0x8   :  { %19 = vsyncpa [#allocation9 + $0x1], 0  ;;  %s1098_s15 = smov 0   ;;  %s1100_s16 = smov 0  }
   0x9   :  { %s1102_s17 = smov 0   ;;  %s1104_s18 = smov 0  }
   0xa   :  { %s1106_s19 = smov 0   ;;  %s1108_s20 = smov 0  }
   0xb LB: > { %s1129_s21 = sadd.s32 4294967295, %s1060_s20   ;;  %s1355_s22 = sadd.s32 4294967294, %s1060_s20   ;;  %s1060_s20 = sphi %s1108_s20, %s25_s20   ;;  %s1056_s19 = sphi %s1106_s19, %s1376_s19   ;;  %s1052_s18 = sphi %s1104_s18, %s1375_s18   ;;  %s1048_s17 = sphi %s1102_s17, %s1374_s17   ;;  %s1044_s16 = sphi %s1100_s16, %s1373_s16   ;;  %s1040_s15 = sphi %s1098_s15, %s1372_s15  }
   0xc   : > { %p59_p0 = scmp.ne.s32.totalorder %s1044_s16, %s1040_s15  ;;  %p1356_p1 = scmp.eq.s32.totalorder %s1129_s21, 0 }
   0xd   : > { %p112_p3 = scmp.eq.s32.totalorder %s1355_s22, 1  ;;  %p690_p5 = scmp.ge.s32.totalorder %s1060_s20, 1 }
   0xe   : > { %p1140_p4 = por %p1356_p1, %p59_p0  ;;  %p175_p7 = scmp.lt.s32.totalorder %s1060_s20, 3 }
   0xf   : > { %p1145_p6 = por %p112_p3, %p59_p0  ;;  %s1062_s26 = smov [#allocation5]  }
  0x10   : > { %p1150_p8 = pnand %p690_p5, %p175_p7  ;;  %s187_s27 = sshll.u32 %s1062_s26, 4  ;;  %s188_s27 = int_to_ptr.vmem [resolvable:$true] %s187_s27 }
  0x11   : > { %s1359_s24 = scalar_select %p1145_p6, 1, 0 }
  0x12   : > { %p770_p9 = pneg %p1150_p8  ;;  %s37_s29 = sadd.s32 1, %s1056_s19 }
  0x13   : > { %s877_s30 = scalar_lea.vmem %s188_s27, 2048  ;;  %p885_p5 = scmp.lt.s32.totalorder %s188_s27, %s188_s27 }
  0x14   : > { %p1159_p11 = pnand %p770_p9, %p1356_p1  ;;  %p878_p13 = scmp.ne.s32.totalorder %s188_s27, %s877_s30 }
  0x15   : > { %p886_p7 = scmp.lt.s32.totalorder %s877_s30, %s877_s30 }
  0x16   : > { %p868_p12 = pneg %p1159_p11 }
  0x17   : > { %p887_p2 = por %p886_p7, %p885_p5 }
  0x18   : > { %p880_p0 = pnand %p878_p13, %p868_p12 }
  0x1a   : > { %p881_p3 = pneg %p880_p0 }
  0x1c   : > { %p888_p6 = pnand %p887_p2, %p881_p3 }
  0x1e   : > { %891 = shalt.err (!%p888_p6)
}
  0x1f   : > { %s1063_s5 = smov 64   ;;  %s1064_s6 = smov 4  }
  0x20   : > { %s1362_s1 = sld [smem:[#allocation15_spill]]  ;;  %p39_p2 = scmp.ge.s32.totalorder %s37_s29, 2 }
  0x21   : > { %s46_s9 = sadd.s32 1, %s1048_s17  ;;  %p53_p6 = scmp.ne.s32.totalorder %s1048_s17, %s1044_s16 }
  0x22   : > { %p54_p9 = scmp.eq.s32.totalorder %s1060_s20, 0  ;;  %s1378_s29 = smov (%p39_p2, %s37_s29), 0 }
  0x23   : > { %p1364_p13 = scmp.eq.s32.totalorder %s1129_s21, 1  ;;  %s41_s12 = ssub.s32 %s1056_s19, %s1378_s29 }
  0x24   : > { %p1177_p12 = por %p54_p9, %p53_p6  ;;  %p789_p3 = scmp.lt.s32.totalorder %s1060_s20, 2 }
  0x25   : > { %p1183_p0 = por %p1364_p13, %p53_p6  ;;  %s201_s13 = sand.u32 1, %s1048_s17  }
  0x26   : > { %773 = dma.hbm_to_vmem [thread:$0]  (!%p1159_p11), %s1362_s1, 2048, %s188_s27, [#allocation6], %s1063_s5, %s1063_s5, %s1064_s6  }
  0x27   : > { %p44_p11 = scmp.eq.s32.totalorder %s41_s12, 0  ;;  %s693_s14 = sshll.u32 %s201_s13, 4 }
  0x28   : > { %s727_s27 = sshll.u32 %s1056_s19, 8  ;;  %s205_s6 = scalar_lea.vmem [#allocation2], %s693_s14 }
  0x29   : > { %s1192_s26 = scalar_select %p44_p11, %s1048_s17, %s46_s9  }
  0x2a   : > { %s214_s5 = scalar_lea.hbm %s1350_s0, %s727_s27  ;;  %s215_s7 = sshll.u32 %s205_s6, 4  ;;  %s216_s7 = int_to_ptr.vmem [resolvable:$true] %s215_s7 }
  0x2b   : > { %p1200_p5 = pnand %p789_p3, %p1177_p12  ;;  %s202_s22 = scalar_lea.sflag [#allocation3], %s201_s13 }
  0x2c   : > { %s905_s12 = scalar_lea.vmem %s216_s7, 256  ;;  %s1065_s9 = smov [#allocation2]  }
  0x2d   : > { %p894_p7 = pneg %p1200_p5  ;;  %p906_p2 = scmp.ne.s32.totalorder %s216_s7, %s905_s12 }
  0x2e   : > { %s910_s1 = sshll.u32 %s1065_s9, 4  ;;  %s911_s1 = int_to_ptr.vmem [resolvable:$false] %s910_s1 }
  0x2f   : > { %p908_p6 = pnand %p906_p2, %p894_p7  ;;  %s912_s27 = scalar_lea.vmem %s911_s1, 512 }
  0x30   : > { %p913_p13 = scmp.lt.s32.totalorder %s216_s7, %s911_s1  ;;  %p914_p11 = scmp.lt.s32.totalorder %s912_s27, %s905_s12 }
  0x31   : > { %p909_p9 = pneg %p908_p6 }
  0x32   : > { %p915_p10 = por %p914_p11, %p913_p13 }
  0x34   : > { %p916_p1 = pnand %p915_p10, %p909_p9 }
  0x36   : > { %919 = shalt.err (!%p916_p1)
}
  0x37   : > { %s1066_s10 = smov 128   ;;  %s1067_s14 = smov 8  }
  0x38   : > { %777 = dma.hbm_to_vmem [thread:$0]  (!%p1200_p5), %s214_s5, 256, %s216_s7, %s202_s22, %s1066_s10, %s1066_s10, %s1067_s14  }
  0x39   : > { %227 = sbr.rel (%p1150_p8) target bundleno = 363 (0x16b), region = 28  ;;  %s1211_s13 = sand.u32 (!%p1150_p8), 1, %s1044_s16  }
  0x3a   : > { %s697_s28 = sshll.u32 (!%p1150_p8), %s1211_s13, 4  ;;  %s230_s1 = scalar_lea.sflag (!%p1150_p8), [#allocation3], %s1211_s13 }
  0x3b   : > { %s1215_s30 = scalar_lea.vmem (!%p1150_p8), [#allocation2], %s697_s28 }
  0x3e   : > { %1023 = dma.done.wait (%p1140_p4), %s230_s1, 256  }
  0x3f   : > { %1025 = vsyncadd (%p1140_p4), %s230_s1, 4294967040  ;;  %p1367_p1 = scmp.eq.s32.totalorder %s1129_s21, 0 }
  0x41   : > { %1027 = dma.done.wait (%p1367_p1), [#allocation6], 2048   ;;  %p1368_p8 = pmov %p1367_p1 }
  0x42   : > { %v847_v0 = vld [vmem:[#allocation5 + $0x78] sm:$0xff]   ;;  %v849_v2 = vld [vmem:[#allocation5 + $0x70] sm:$0xff]   ;;  %v851_v4 = vld [vmem:[#allocation5 + $0x68] sm:$0xff]   ;;  %s699_s22 = sshll.u32 %s1211_s13, 3  ;;  %s730_s23 = sshll.u32 %s1052_s18, 7 }
  0x43   : > { %1029 = vsyncadd (%p1368_p8), [#allocation6], 4294965248  ;;  %v848_v1 = vld [vmem:[#allocation5 + $0x38] sm:$0xff]   ;;  %736 = vmatprep.subr.bf16.mxu0 %v847_v0  ;;  %v850_v3 = vld [vmem:[#allocation5 + $0x30] sm:$0xff]   ;;  %s257_s25 = scalar_lea.vmem [#allocation7], %s699_s22  ;;  %s1232_s8 = scalar_lea.hbm %s1352_s2, %s730_s23 }
  0x44   : > { %737 = vmatpush3.bf16.msra.mxu0 %v848_v1  ;;  %v852_v5 = vld [vmem:[#allocation5 + $0x28] sm:$0xff]   ;;  %v853_v6 = vld [vmem:[#allocation5 + $0x60] sm:$0xff]   ;;  %v855_v8 = vld [vmem:[#allocation5 + $0x58] sm:$0xff]   ;;  %s508_s5 = sshll.u32 %s257_s25, 4  ;;  %s485_s12 = scalar_lea.sflag [#allocation4], %s1211_s13  ;;  %s1234_s5 = int_to_ptr.vmem [resolvable:$true] %s508_s5 }
  0x45   : > { %738 = vmatprep.subr.bf16.mxu0 %v849_v2  ;;  %v854_v7 = vld [vmem:[#allocation5 + $0x20] sm:$0xff]   ;;  %v856_v9 = vld [vmem:[#allocation5 + $0x18] sm:$0xff]   ;;  %v857_v10 = vld [vmem:[#allocation5 + $0x50] sm:$0xff]   ;;  %s920_s9 = scalar_lea.vmem %s1234_s5, 128  ;;  %s1068_s27 = smov [#allocation7]  }
  0x46   : > { %v865_v11 = vld [vmem:[%s1215_s30 + $0x4] ss:$8 sps:$4 sm:$0xff]   ;;  %v863_v17 = vld [vmem:[%s1215_s30] ss:$8 sps:$4 sm:$0xff]   ;;  %p921_p4 = scmp.ne.s32.totalorder %s1234_s5, %s920_s9  ;;  %s924_s10 = sshll.u32 %s1068_s27, 4  ;;  %s925_s10 = int_to_ptr.vmem [resolvable:$false] %s924_s10 }
  0x47   : > { %v858_v12 = vld [vmem:[#allocation5 + $0x10] sm:$0xff]   ;;  %447 = vmatprep.mubr.bf16.mxu0 %v865_v11  ;;  %v859_v13 = vld [vmem:[#allocation5 + $0x48] sm:$0xff]   ;;  %v861_v15 = vld [vmem:[#allocation5 + $0x40] sm:$0xff]   ;;  %s926_s14 = scalar_lea.vmem %s925_s10, 256  ;;  %p927_p3 = scmp.lt.s32.totalorder %s1234_s5, %s925_s10 }
  0x48   : > { %739 = vmatpush3.bf16.msra.mxu0 %v850_v3  ;;  %v860_v14 = vld [vmem:[#allocation5 + $0x8] sm:$0xff]   ;;  %v862_v16 = vld [vmem:[#allocation5] sm:$0xff]   ;;  %p922_p10 = pnand %p921_p4, %p1183_p0  ;;  %p928_p5 = scmp.lt.s32.totalorder %s926_s14, %s920_s9 }
  0x49   : > { %740 = vmatprep.subr.bf16.mxu0 %v851_v4 }
  0x4a   : > { %p923_p12 = pneg %p922_p10  ;;  %p929_p7 = por %p928_p5, %p927_p3 }
  0x4c   : > { %741 = vmatpush3.bf16.msra.mxu0 %v852_v5  ;;  %p930_p2 = pnand %p929_p7, %p923_p12 }
  0x4d   : > { %742 = vmatprep.subr.bf16.mxu0 %v853_v6 }
  0x50   : > { %743 = vmatpush3.bf16.msra.mxu0 %v854_v7 }
  0x51   : > { %744 = vmatprep.subr.bf16.mxu0 %v855_v8 }
  0x54   : > { %745 = vmatpush3.bf16.msra.mxu0 %v856_v9 }
  0x55   : > { %746 = vmatprep.subr.bf16.mxu0 %v857_v10 }
  0x58   : > { %747 = vmatpush3.bf16.msra.mxu0 %v858_v12 }
  0x59   : > { %748 = vmatprep.subr.bf16.mxu0 %v859_v13 }
  0x5c   : > { %749 = vmatpush3.bf16.msra.mxu0 %v860_v14 }
  0x5d   : > { %750 = vmatprep.subr.bf16.mxu0 %v861_v15 }
  0x60   : > { %751 = vmatpush3.bf16.msra.mxu0 %v862_v16 }
  0x63   : > { %448 = vmatmul.mubr.bf16.vlgmr.msra.gmra.mxu0 %v863_v17 }
 0x123   : > { %v752_v18 = vpop.f32.mrf.mxu0 }
 0x125   : > { %v753_v19 = vpop.f32.mrf.mxu0 }
 0x126   : > { %v754_v21 = vadd.f32 %v753_v19, %v752_v18 }
 0x127   : > { %v755_v20 = vpop.f32.mrf.mxu0 }
 0x128   : > { %v474_v24 = vmul.f32 %v754_v21, %v754_v21 }
 0x129   : > { %v756_v22 = vpop.f32.mrf.mxu0 }
 0x12a   : > { %v757_v23 = vadd.f32 %v756_v22, %v755_v20 }
 0x12c   : > { %v734_v25 = vpack.c.bf16 %v757_v23, %v754_v21  ;;  %v466_v26 = vadd.f32 %v757_v23, %v754_v21  ;;  %v475_v27 = vmul.f32 %v757_v23, %v757_v23 }
 0x12e   : > { %735 = vst [vmem:[%s257_s25] sm:$0xff] %v734_v25   ;;  %v467_v28 = vrot.slane %v466_v26, 4  ;;  %v476_v29 = vadd.f32 %v475_v27, %v474_v24 }
 0x12f   : > { %933 = shalt.err (!%p930_p2)
}
 0x130   : > { %s934_s28 = scalar_lea.hbm %s1232_s8, 128  ;;  %s938_s22 = scalar_lea.hbm %s1352_s2, 256 }
 0x131   : > { %p935_p6 = scmp.ne.s32.totalorder %s1232_s8, %s934_s28  ;;  %p939_p11 = scmp.lt.s32.totalorder %s1232_s8, %s1352_s2 }
 0x132   : > { %p940_p1 = scmp.lt.s32.totalorder %s938_s22, %s934_s28 }
 0x133   : > { %p936_p9 = pnand %p935_p6, %p1183_p0 }
 0x134   : > { %p941_p8 = por %p940_p1, %p939_p11 }
 0x135   : > { %p937_p13 = pneg %p936_p9 }
 0x137   : > { %p942_p4 = pnand %p941_p8, %p937_p13 }
 0x139   : > { %945 = shalt.err (!%p942_p4)
}
 0x13a   : > { %s1069_s6 = smov 64   ;;  %s1070_s7 = smov 4   ;;  %v468_v30 = vadd.f32 %v467_v28, %v466_v26  ;;  %v477_v31 = vrot.slane %v476_v29, 4 }
 0x13b   : > { %764 = dma.vmem_to_hbm [thread:$0]  (%p1183_p0), %s1234_s5, 128, %s1232_s8, %s485_s12, %s1069_s6, %s1069_s6, %s1070_s7  }
 0x13c   : > { %v469_v32 = vrot.slane %v468_v30, 2  ;;  %v478_v33 = vadd.f32 %v477_v31, %v476_v29  ;;  %s489_s9 = sand.u32 1, %s1129_s21   ;;  %s723_s27 = sshll.u32 %s1052_s18, 4 }
 0x13d   : > { %s263_s10 = scalar_lea.vmem [#allocation8], %s1211_s13  ;;  %s269_s28 = scalar_lea.vmem [#allocation10], %s1211_s13 }
 0x13e   : > { %v470_v34 = vadd.f32 %v469_v32, %v468_v30  ;;  %v479_v35 = vrot.slane %v478_v33, 2  ;;  %s525_s14 = sshll.u32 %s263_s10, 4  ;;  %s539_s1 = sshll.u32 %s269_s28, 4  ;;  %s1270_s14 = int_to_ptr.vmem [resolvable:$true] %s525_s14  ;;  %s1277_s1 = int_to_ptr.vmem [resolvable:$true] %s539_s1 }
 0x13f   : > { %s1268_s8 = scalar_lea.hbm %s1353_s3, %s723_s27  ;;  %s1275_s12 = scalar_lea.hbm %s1354_s4, %s723_s27 }
 0x140   : > { %v471_v36 = vrot.slane %v470_v34, 1  ;;  %v480_v37 = vadd.f32 %v479_v35, %v478_v33  ;;  %s1279_s22 = scalar_lea.sflag [#allocation9], %s489_s9  ;;  %s946_s23 = scalar_lea.vmem %s1270_s14, 16 }
 0x141   : > { %p947_p10 = scmp.ne.s32.totalorder %s1270_s14, %s946_s23  ;;  %s1071_s25 = smov [#allocation8]  }
 0x142   : > { %v481_v38 = vrot.slane %v480_v37, 1  ;;  %v472_v39 = vadd.f32 %v471_v36, %v470_v34  ;;  %s950_s6 = sshll.u32 %s1071_s25, 4  ;;  %s951_s6 = int_to_ptr.vmem [resolvable:$false] %s950_s6 }
 0x143   : > { %p948_p12 = pnand %p947_p10, %p1183_p0  ;;  %s952_s7 = scalar_lea.vmem %s951_s6, 32 }
 0x144   : > { %473 = vst [vmem:[%s263_s10] sm:$0x1] %v472_v39  ;;  %v482_v40 = vadd.f32 %v481_v38, %v480_v37  ;;  %p953_p5 = scmp.lt.s32.totalorder %s1270_s14, %s951_s6  ;;  %p954_p7 = scmp.lt.s32.totalorder %s952_s7, %s946_s23 }
 0x145   : > { %p949_p3 = pneg %p948_p12 }
 0x146   : > { %p955_p2 = por %p954_p7, %p953_p5 }
 0x148   : > { %p956_p6 = pnand %p955_p2, %p949_p3 }
 0x14a   : > { %959 = shalt.err (!%p956_p6)
}
 0x14b   : > { %s960_s9 = scalar_lea.hbm %s1268_s8, 16  ;;  %s964_s30 = scalar_lea.hbm %s1353_s3, 32 }
 0x14c   : > { %p961_p9 = scmp.ne.s32.totalorder %s1268_s8, %s960_s9  ;;  %p965_p1 = scmp.lt.s32.totalorder %s1268_s8, %s1353_s3 }
 0x14d   : > { %p966_p8 = scmp.lt.s32.totalorder %s964_s30, %s960_s9 }
 0x14e   : > { %p962_p13 = pnand %p961_p9, %p1183_p0 }
 0x14f   : > { %p967_p4 = por %p966_p8, %p965_p1 }
 0x150   : > { %p963_p11 = pneg %p962_p13 }
 0x152   : > { %p968_p10 = pnand %p967_p4, %p963_p11 }
 0x154   : > { %971 = shalt.err (!%p968_p10)
}
 0x155   : > { %765 = dma.vmem_to_hbm [thread:$0]  (%p1183_p0), %s1270_s14, 16, %s1268_s8, %s1279_s22   ;;  %483 = vst [vmem:[%s269_s28] sm:$0x1] %v482_v40 }
 0x156   : > { %s972_s21 = scalar_lea.vmem %s1277_s1, 16  ;;  %s1072_s23 = smov [#allocation10]  }
 0x157   : > { %p973_p12 = scmp.ne.s32.totalorder %s1277_s1, %s972_s21  ;;  %s976_s25 = sshll.u32 %s1072_s23, 4  ;;  %s977_s25 = int_to_ptr.vmem [resolvable:$false] %s976_s25 }
 0x158   : > { %s978_s6 = scalar_lea.vmem %s977_s25, 32  ;;  %p979_p7 = scmp.lt.s32.totalorder %s1277_s1, %s977_s25 }
 0x159   : > { %p974_p3 = pnand %p973_p12, %p1183_p0  ;;  %p980_p2 = scmp.lt.s32.totalorder %s978_s6, %s972_s21 }
 0x15b   : > { %p975_p5 = pneg %p974_p3  ;;  %p981_p6 = por %p980_p2, %p979_p7 }
 0x15d   : > { %p982_p9 = pnand %p981_p6, %p975_p5 }
 0x15f   : > { %985 = shalt.err (!%p982_p9)
}
 0x160   : > { %s986_s13 = scalar_lea.hbm %s1275_s12, 16  ;;  %s990_s8 = scalar_lea.hbm %s1354_s4, 32 }
 0x161   : > { %p987_p13 = scmp.ne.s32.totalorder %s1275_s12, %s986_s13  ;;  %p991_p8 = scmp.lt.s32.totalorder %s1275_s12, %s1354_s4 }
 0x162   : > { %p992_p4 = scmp.lt.s32.totalorder %s990_s8, %s986_s13 }
 0x163   : > { %p988_p11 = pnand %p987_p13, %p1183_p0 }
 0x164   : > { %p993_p10 = por %p992_p4, %p991_p8 }
 0x165   : > { %p989_p1 = pneg %p988_p11 }
 0x167   : > { %p994_p12 = pnand %p993_p10, %p989_p1 }
 0x169   : > { %997 = shalt.err (!%p994_p12)
}
 0x16a   : > { %766 = dma.vmem_to_hbm [thread:$0]  (%p1183_p0), %s1277_s1, 16, %s1275_s12, %s1279_s22  }
 0x16b PF: > { %s551_s27 = sand.u32 1, %s1040_s15   ;;  %p1369_p3 = scmp.ne.s32.totalorder %s1359_s24, 0 }
 0x16c   : > { %p1370_p5 = scmp.ge.s32.totalorder %s1060_s20, 2  ;;  %s552_s10 = scalar_lea.sflag [#allocation4], %s551_s27 }
 0x16e   : > { %p779_p7 = pnand %p1370_p5, %p1369_p3 }
 0x170   : > { %p780_p2 = pneg %p779_p7 }
 0x172   : > { %1031 = dma.done.wait (%p780_p2), %s552_s10, 128  }
 0x173   : > { %1033 = vsyncadd (%p780_p2), %s552_s10, 4294967168  ;;  %s1371_s30 = sadd.s32 4294967294, %s1060_s20  }
 0x174   : > { %s560_s5 = sand.u32 1, %s1371_s30  }
 0x175   : > { %s561_s11 = scalar_lea.sflag [#allocation9], %s560_s5 }
 0x176   : > { %1035 = dma.done.wait (%p780_p2), %s561_s11, 32  }
 0x177   : > { %1037 = vsyncadd (%p780_p2), %s561_s11, 4294967264  ;;  %s25_s20 = sadd.s32 1, %s1060_s20   ;;  %s1372_s15 = smov %s1044_s16 }
 0x178   : > { %p22_p0 = scmp.ge.s32.totalorder %s25_s20, 4   ;;  %s1373_s16 = smov %s1048_s17 }
 0x179   : > { %s1374_s17 = smov %s1192_s26  ;;  %s1375_s18 = smov %s1056_s19 }
 0x17a   : > { %s1376_s19 = smov %s1378_s29  ;;  %24 = sbr.rel (!%p22_p0) target bundleno = 11 (0xb), region = 109 }
 0x17f   :  { %573 = vsyncpa [#allocation3], 1 }
 0x180   :  { %575 = vsyncpa [#allocation3 + $0x1], 1 }
 0x181   :  { %576 = vsyncpa [#allocation6], 1 }
 0x182   :  { %577 = vsyncpa [#allocation4], 1 }
 0x183   :  { %579 = vsyncpa [#allocation4 + $0x1], 1 }
 0x184   :  { %580 = vsyncpa [#allocation9], 1 }
 0x185   :  { %582 = vsyncpa [#allocation9 + $0x1], 1 }

</bundles_post_ra>
